<compile_context>
chip_gen: v7x
topology: tpu7x:2x2x1
jax: 0.10.0
libtpu: 0.0.40
codegen_flags: <defaults>
</compile_context>

<pallas_src>
import functools
import math

import jax
import jax.numpy as jnp
from jax.experimental import pallas as pl
from jax.experimental.pallas import tpu as pltpu

_LANE = 128
_TR_MAX = 8192      # max rows of one sample per grid step (4 MiB f32 / input block)
_PACK_ROWS = 2048   # max tb*tr rows per grid step when packing small samples
_TB_MAX = 256       # cap samples per grid step (bounds accumulator scratch at 5 MiB)
_CHUNK = 512        # rows per inner accumulation chunk (256 KiB f32 per input)
_VMEM_LIMIT = 32 * 1024 * 1024


def _neg_pearson_kernel(x_ref, y_ref, o_ref,
                        sx_ref, sy_ref, sxy_ref, sx2_ref, sy2_ref,
                        *, true_n: float, num_r: int, tb: int, tr: int,
                        chunk: int):
    r_step = pl.program_id(1)

    @pl.when(r_step == 0)
    def _():
        for ref in (sx_ref, sy_ref, sxy_ref, sx2_ref, sy2_ref):
            ref[...] = jnp.zeros_like(ref)

    def fold(v, size):
        # (tb, size, 128) -> (tb, 8, 128): group rows into vregs and add them
        # elementwise (VPU only, no cross-lane work in the streaming loop).
        return jnp.sum(v.reshape(tb, size // 8, 8, _LANE), axis=1)

    def accumulate(start, size):
        xs = x_ref[:, pl.ds(start, size), :].astype(jnp.float32)
        ys = y_ref[:, pl.ds(start, size), :].astype(jnp.float32)
        sx_ref[...] += fold(xs, size)
        sy_ref[...] += fold(ys, size)
        sxy_ref[...] += fold(xs * ys, size)
        sx2_ref[...] += fold(xs * xs, size)
        sy2_ref[...] += fold(ys * ys, size)

    n_full = tr // chunk
    rem = tr - n_full * chunk     # multiple of 8 (both tr and chunk are)

    if n_full == 1:
        accumulate(0, chunk)
    else:
        @pl.loop(0, n_full)
        def _(c):
            accumulate(pl.multiple_of(c * chunk, chunk), chunk)
    if rem:
        accumulate(n_full * chunk, rem)

    @pl.when(r_step == num_r - 1)
    def _():
        n = jnp.float32(true_n)

        def tot(ref):  # (tb, 8, 128) -> (tb, 1, 1): reduced once per sample
            a = ref[...]
            return jnp.sum(jnp.sum(a, axis=2, keepdims=True), axis=1,
                           keepdims=True)

        tsx = tot(sx_ref)
        tsy = tot(sy_ref)
        num = n * tot(sxy_ref) - tsx * tsy
        den_sq = (n * tot(sx2_ref) - tsx * tsx) * (n * tot(sy2_ref) - tsy * tsy)
        res = jnp.float32(1.0) - num * jax.lax.rsqrt(den_sq)   # (tb, 1, 1)
        o_ref[...] = jnp.broadcast_to(res, o_ref.shape)


def neg_pearson_loss(preds: jax.Array, labels: jax.Array) -> jax.Array:
    assert preds.shape == labels.shape, (
        f"Inputs should have the same shape: {preds.shape} vs {labels.shape}."
    )
    b = preds.shape[0]
    n = math.prod(preds.shape[1:])

    x = preds.reshape(b, n)
    y = labels.reshape(b, n)

    # --- choose tiling (all trace-time Python) ------------------------------
    r = (n + _LANE - 1) // _LANE          # 128-lane rows per sample
    r8 = ((r + 7) // 8) * 8               # rounded to a sublane multiple

    if r8 <= _TR_MAX:
        nr = 1
        tr = r8
    else:
        nr0 = (r8 + _TR_MAX - 1) // _TR_MAX
        tr = (((r8 + nr0 - 1) // nr0) + 7) // 8 * 8
        nr = (r8 + tr - 1) // tr
    r_pad = nr * tr
    chunk = min(tr, _CHUNK)

    # Batch packing: several small samples per grid step.
    if nr == 1:
        tb = max(1, min(b, _PACK_ROWS // tr, _TB_MAX))
    else:
        tb = 1
    if b >= 2:
        tb = min(tb, (b + 1) // 2)        # keep >= 2 batch steps (v7x megacore)
    nb = (b + tb - 1) // tb
    b_pad = nb * tb

    # --- pad (exact: zeros don't change raw sums; true N used in formula) ---
    n_pad = r_pad * _LANE
    if n_pad != n or b_pad != b:
        x = jnp.pad(x, ((0, b_pad - b), (0, n_pad - n)))
        y = jnp.pad(y, ((0, b_pad - b), (0, n_pad - n)))

    # Splitting the last dim of a contiguous (b_pad, n_pad) array: bitcast,
    # no HBM relayout copy.
    x = x.reshape(b_pad, r_pad, _LANE)
    y = y.reshape(b_pad, r_pad, _LANE)

    kernel = functools.partial(
        _neg_pearson_kernel,
        true_n=float(n), num_r=nr, tb=tb, tr=tr, chunk=chunk)

    out = pl.pallas_call(
        kernel,
        out_shape=jax.ShapeDtypeStruct((b_pad, 1, _LANE), jnp.float32),
        grid_spec=pltpu.PrefetchScalarGridSpec(
            num_scalar_prefetch=0,
            grid=(nb, nr),
            in_specs=[
                pl.BlockSpec((tb, tr, _LANE), lambda bi, ri: (bi, ri, 0)),
                pl.BlockSpec((tb, tr, _LANE), lambda bi, ri: (bi, ri, 0)),
            ],
            out_specs=pl.BlockSpec((tb, 1, _LANE), lambda bi, ri: (bi, 0, 0)),
            scratch_shapes=[pltpu.VMEM((tb, 8, _LANE), jnp.float32)] * 5,
        ),
        compiler_params=pltpu.CompilerParams(
            dimension_semantics=("parallel", "arbitrary"),
            vmem_limit_bytes=_VMEM_LIMIT),
    )(x, y)

    per_sample = out[:b, 0, 0]            # (B,) = 1 - pearson_i
    return jnp.mean(per_sample)


def _neg_pearson_ref(preds, labels):
    b = preds.shape[0]
    x = preds.reshape(b, -1).astype(jnp.float32)
    y = labels.reshape(b, -1).astype(jnp.float32)
    n = x.shape[1]
    sum_x = jnp.sum(x, axis=1)
    sum_y = jnp.sum(y, axis=1)
    sum_xy = jnp.sum(x * y, axis=1)
    sum_x2 = jnp.sum(x * x, axis=1)
    sum_y2 = jnp.sum(y * y, axis=1)
    pearson = (n * sum_xy - sum_x * sum_y) / jnp.sqrt(
        (n * sum_x2 - sum_x**2) * (n * sum_y2 - sum_y**2)
    )
    return jnp.mean(1.0 - pearson)


if __name__ == "__main__":
    key = jax.random.PRNGKey(0)
    k1, k2 = jax.random.split(key)
    # NCHW inputs, small shapes: B=2, C=4, H=W=16 -> N = 1024 per sample.
    preds = jax.random.normal(k1, (2, 4, 16, 16), dtype=jnp.float32)
    labels = jax.random.normal(k2, (2, 4, 16, 16), dtype=jnp.float32)

    loss = jax.block_until_ready(neg_pearson_loss(preds, labels))
    ref = jax.block_until_ready(_neg_pearson_ref(preds, labels))

    assert jnp.allclose(loss, ref, rtol=1e-5, atol=1e-5), (loss, ref)
    print("KERNEL_OK")
</pallas_src>

<mosaic_0001>
module attributes {stable_mosaic.version = 11 : i64} {
  func.func @_neg_pearson_kernel(%arg0: i32, %arg1: i32, %arg2: memref<1x8x128xf32, #tpu.memory_space<vmem>>, %arg3: memref<1x8x128xf32, #tpu.memory_space<vmem>>, %arg4: memref<1x1x128xf32, #tpu.memory_space<vmem>>, %arg5: memref<1x8x128xf32, #tpu.memory_space<vmem>>, %arg6: memref<1x8x128xf32, #tpu.memory_space<vmem>>, %arg7: memref<1x8x128xf32, #tpu.memory_space<vmem>>, %arg8: memref<1x8x128xf32, #tpu.memory_space<vmem>>, %arg9: memref<1x8x128xf32, #tpu.memory_space<vmem>>) attributes {dimension_semantics = [#tpu.dimension_semantics<parallel>, #tpu.dimension_semantics<arbitrary>], iteration_bounds = array<i64: 2, 1>, scalar_prefetch = 0 : i64, scratch_operands = 5 : i64, tpu.core_type = #tpu.core_type<tc>, window_params = [{transform_indices = @transform_0, window_bounds = array<i64: 1, 8, 128>}, {transform_indices = @transform_1, window_bounds = array<i64: 1, 8, 128>}, {transform_indices = @transform_2, window_bounds = array<i64: 1, 1, 128>}]} {
    %c0_i32 = arith.constant 0 : i32
    %0 = arith.cmpi eq, %arg1, %c0_i32 : i32
    %1 = arith.extui %0 : i1 to i32
    %c0_i32_0 = arith.constant 0 : i32
    %2 = arith.cmpi ne, %1, %c0_i32_0 : i32
    scf.if %2 {
      %cst_42 = arith.constant 0.000000e+00 : f32
      %36 = vector.broadcast %cst_42 : f32 to vector<1x8x128xf32>
      %c0_43 = arith.constant 0 : index
      %c0_44 = arith.constant 0 : index
      %c0_45 = arith.constant 0 : index
      %37 = vector.load %arg5[%c0_43, %c0_44, %c0_45] : memref<1x8x128xf32, #tpu.memory_space<vmem>>, vector<1x8x128xf32>
      tpu.vector_store %arg5[%c0_43, %c0_44, %c0_45], %36 {strides = array<i32>} : memref<1x8x128xf32, #tpu.memory_space<vmem>>, vector<1x8x128xf32>,
      %cst_46 = arith.constant 0.000000e+00 : f32
      %38 = vector.broadcast %cst_46 : f32 to vector<1x8x128xf32>
      %c0_47 = arith.constant 0 : index
      %c0_48 = arith.constant 0 : index
      %c0_49 = arith.constant 0 : index
      %39 = vector.load %arg6[%c0_47, %c0_48, %c0_49] : memref<1x8x128xf32, #tpu.memory_space<vmem>>, vector<1x8x128xf32>
      tpu.vector_store %arg6[%c0_47, %c0_48, %c0_49], %38 {strides = array<i32>} : memref<1x8x128xf32, #tpu.memory_space<vmem>>, vector<1x8x128xf32>,
      %cst_50 = arith.constant 0.000000e+00 : f32
      %40 = vector.broadcast %cst_50 : f32 to vector<1x8x128xf32>
      %c0_51 = arith.constant 0 : index
      %c0_52 = arith.constant 0 : index
      %c0_53 = arith.constant 0 : index
      %41 = vector.load %arg7[%c0_51, %c0_52, %c0_53] : memref<1x8x128xf32, #tpu.memory_space<vmem>>, vector<1x8x128xf32>
      tpu.vector_store %arg7[%c0_51, %c0_52, %c0_53], %40 {strides = array<i32>} : memref<1x8x128xf32, #tpu.memory_space<vmem>>, vector<1x8x128xf32>,
      %cst_54 = arith.constant 0.000000e+00 : f32
      %42 = vector.broadcast %cst_54 : f32 to vector<1x8x128xf32>
      %c0_55 = arith.constant 0 : index
      %c0_56 = arith.constant 0 : index
      %c0_57 = arith.constant 0 : index
      %43 = vector.load %arg8[%c0_55, %c0_56, %c0_57] : memref<1x8x128xf32, #tpu.memory_space<vmem>>, vector<1x8x128xf32>
      tpu.vector_store %arg8[%c0_55, %c0_56, %c0_57], %42 {strides = array<i32>} : memref<1x8x128xf32, #tpu.memory_space<vmem>>, vector<1x8x128xf32>,
      %cst_58 = arith.constant 0.000000e+00 : f32
      %44 = vector.broadcast %cst_58 : f32 to vector<1x8x128xf32>
      %c0_59 = arith.constant 0 : index
      %c0_60 = arith.constant 0 : index
      %c0_61 = arith.constant 0 : index
      %45 = vector.load %arg9[%c0_59, %c0_60, %c0_61] : memref<1x8x128xf32, #tpu.memory_space<vmem>>, vector<1x8x128xf32>
      tpu.vector_store %arg9[%c0_59, %c0_60, %c0_61], %44 {strides = array<i32>} : memref<1x8x128xf32, #tpu.memory_space<vmem>>, vector<1x8x128xf32>,
    } else {
    }
    %c0 = arith.constant 0 : index
    %c0_1 = arith.constant 0 : index
    %c0_2 = arith.constant 0 : index
    %3 = vector.load %arg2[%c0, %c0_1, %c0_2] : memref<1x8x128xf32, #tpu.memory_space<vmem>>, vector<1x8x128xf32>
    %c0_3 = arith.constant 0 : index
    %c0_4 = arith.constant 0 : index
    %c0_5 = arith.constant 0 : index
    %4 = vector.load %arg3[%c0_3, %c0_4, %c0_5] : memref<1x8x128xf32, #tpu.memory_space<vmem>>, vector<1x8x128xf32>
    %c0_6 = arith.constant 0 : index
    %c0_7 = arith.constant 0 : index
    %c0_8 = arith.constant 0 : index
    %5 = vector.load %arg5[%c0_6, %c0_7, %c0_8] : memref<1x8x128xf32, #tpu.memory_space<vmem>>, vector<1x8x128xf32>
    %6 = vector.shape_cast %3 : vector<1x8x128xf32> to vector<1x1x8x128xf32>
    %cst = arith.constant dense<0.000000e+00> : vector<1x8x128xf32>
    %7 = vector.multi_reduction <add>, %6, %cst [1] : vector<1x1x8x128xf32> to vector<1x8x128xf32>
    %8 = arith.addf %5, %7 : vector<1x8x128xf32>
    %c0_9 = arith.constant 0 : index
    %c0_10 = arith.constant 0 : index
    %c0_11 = arith.constant 0 : index
    %9 = vector.load %arg5[%c0_9, %c0_10, %c0_11] : memref<1x8x128xf32, #tpu.memory_space<vmem>>, vector<1x8x128xf32>
    tpu.vector_store %arg5[%c0_9, %c0_10, %c0_11], %8 {strides = array<i32>} : memref<1x8x128xf32, #tpu.memory_space<vmem>>, vector<1x8x128xf32>,
    %c0_12 = arith.constant 0 : index
    %c0_13 = arith.constant 0 : index
    %c0_14 = arith.constant 0 : index
    %10 = vector.load %arg6[%c0_12, %c0_13, %c0_14] : memref<1x8x128xf32, #tpu.memory_space<vmem>>, vector<1x8x128xf32>
    %11 = vector.shape_cast %4 : vector<1x8x128xf32> to vector<1x1x8x128xf32>
    %cst_15 = arith.constant dense<0.000000e+00> : vector<1x8x128xf32>
    %12 = vector.multi_reduction <add>, %11, %cst_15 [1] : vector<1x1x8x128xf32> to vector<1x8x128xf32>
    %13 = arith.addf %10, %12 : vector<1x8x128xf32>
    %c0_16 = arith.constant 0 : index
    %c0_17 = arith.constant 0 : index
    %c0_18 = arith.constant 0 : index
    %14 = vector.load %arg6[%c0_16, %c0_17, %c0_18] : memref<1x8x128xf32, #tpu.memory_space<vmem>>, vector<1x8x128xf32>
    tpu.vector_store %arg6[%c0_16, %c0_17, %c0_18], %13 {strides = array<i32>} : memref<1x8x128xf32, #tpu.memory_space<vmem>>, vector<1x8x128xf32>,
    %c0_19 = arith.constant 0 : index
    %c0_20 = arith.constant 0 : index
    %c0_21 = arith.constant 0 : index
    %15 = vector.load %arg7[%c0_19, %c0_20, %c0_21] : memref<1x8x128xf32, #tpu.memory_space<vmem>>, vector<1x8x128xf32>
    %16 = arith.mulf %3, %4 : vector<1x8x128xf32>
    %17 = vector.shape_cast %16 : vector<1x8x128xf32> to vector<1x1x8x128xf32>
    %cst_22 = arith.constant dense<0.000000e+00> : vector<1x8x128xf32>
    %18 = vector.multi_reduction <add>, %17, %cst_22 [1] : vector<1x1x8x128xf32> to vector<1x8x128xf32>
    %19 = arith.addf %15, %18 : vector<1x8x128xf32>
    %c0_23 = arith.constant 0 : index
    %c0_24 = arith.constant 0 : index
    %c0_25 = arith.constant 0 : index
    %20 = vector.load %arg7[%c0_23, %c0_24, %c0_25] : memref<1x8x128xf32, #tpu.memory_space<vmem>>, vector<1x8x128xf32>
    tpu.vector_store %arg7[%c0_23, %c0_24, %c0_25], %19 {strides = array<i32>} : memref<1x8x128xf32, #tpu.memory_space<vmem>>, vector<1x8x128xf32>,
    %c0_26 = arith.constant 0 : index
    %c0_27 = arith.constant 0 : index
    %c0_28 = arith.constant 0 : index
    %21 = vector.load %arg8[%c0_26, %c0_27, %c0_28] : memref<1x8x128xf32, #tpu.memory_space<vmem>>, vector<1x8x128xf32>
    %22 = arith.mulf %3, %3 : vector<1x8x128xf32>
    %23 = vector.shape_cast %22 : vector<1x8x128xf32> to vector<1x1x8x128xf32>
    %cst_29 = arith.constant dense<0.000000e+00> : vector<1x8x128xf32>
    %24 = vector.multi_reduction <add>, %23, %cst_29 [1] : vector<1x1x8x128xf32> to vector<1x8x128xf32>
    %25 = arith.addf %21, %24 : vector<1x8x128xf32>
    %c0_30 = arith.constant 0 : index
    %c0_31 = arith.constant 0 : index
    %c0_32 = arith.constant 0 : index
    %26 = vector.load %arg8[%c0_30, %c0_31, %c0_32] : memref<1x8x128xf32, #tpu.memory_space<vmem>>, vector<1x8x128xf32>
    tpu.vector_store %arg8[%c0_30, %c0_31, %c0_32], %25 {strides = array<i32>} : memref<1x8x128xf32, #tpu.memory_space<vmem>>, vector<1x8x128xf32>,
    %c0_33 = arith.constant 0 : index
    %c0_34 = arith.constant 0 : index
    %c0_35 = arith.constant 0 : index
    %27 = vector.load %arg9[%c0_33, %c0_34, %c0_35] : memref<1x8x128xf32, #tpu.memory_space<vmem>>, vector<1x8x128xf32>
    %28 = arith.mulf %4, %4 : vector<1x8x128xf32>
    %29 = vector.shape_cast %28 : vector<1x8x128xf32> to vector<1x1x8x128xf32>
    %cst_36 = arith.constant dense<0.000000e+00> : vector<1x8x128xf32>
    %30 = vector.multi_reduction <add>, %29, %cst_36 [1] : vector<1x1x8x128xf32> to vector<1x8x128xf32>
    %31 = arith.addf %27, %30 : vector<1x8x128xf32>
    %c0_37 = arith.constant 0 : index
    %c0_38 = arith.constant 0 : index
    %c0_39 = arith.constant 0 : index
    %32 = vector.load %arg9[%c0_37, %c0_38, %c0_39] : memref<1x8x128xf32, #tpu.memory_space<vmem>>, vector<1x8x128xf32>
    tpu.vector_store %arg9[%c0_37, %c0_38, %c0_39], %31 {strides = array<i32>} : memref<1x8x128xf32, #tpu.memory_space<vmem>>, vector<1x8x128xf32>,
    %c0_i32_40 = arith.constant 0 : i32
    %33 = arith.cmpi eq, %arg1, %c0_i32_40 : i32
    %34 = arith.extui %33 : i1 to i32
    %c0_i32_41 = arith.constant 0 : i32
    %35 = arith.cmpi ne, %34, %c0_i32_41 : i32
    scf.if %35 {
      %c0_42 = arith.constant 0 : index
      %c0_43 = arith.constant 0 : index
      %c0_44 = arith.constant 0 : index
      %36 = vector.load %arg5[%c0_42, %c0_43, %c0_44] : memref<1x8x128xf32, #tpu.memory_space<vmem>>, vector<1x8x128xf32>
      %cst_45 = arith.constant dense<0.000000e+00> : vector<1x8xf32>
      %37 = vector.multi_reduction <add>, %36, %cst_45 [2] : vector<1x8x128xf32> to vector<1x8xf32>
      %38 = vector.shape_cast %37 : vector<1x8xf32> to vector<1x8x1xf32>
      %cst_46 = arith.constant dense<0.000000e+00> : vector<1x1xf32>
      %39 = vector.multi_reduction <add>, %38, %cst_46 [1] : vector<1x8x1xf32> to vector<1x1xf32>
      %40 = vector.shape_cast %39 : vector<1x1xf32> to vector<1x1x1xf32>
      %c0_47 = arith.constant 0 : index
      %c0_48 = arith.constant 0 : index
      %c0_49 = arith.constant 0 : index
      %41 = vector.load %arg6[%c0_47, %c0_48, %c0_49] : memref<1x8x128xf32, #tpu.memory_space<vmem>>, vector<1x8x128xf32>
      %cst_50 = arith.constant dense<0.000000e+00> : vector<1x8xf32>
      %42 = vector.multi_reduction <add>, %41, %cst_50 [2] : vector<1x8x128xf32> to vector<1x8xf32>
      %43 = vector.shape_cast %42 : vector<1x8xf32> to vector<1x8x1xf32>
      %cst_51 = arith.constant dense<0.000000e+00> : vector<1x1xf32>
      %44 = vector.multi_reduction <add>, %43, %cst_51 [1] : vector<1x8x1xf32> to vector<1x1xf32>
      %45 = vector.shape_cast %44 : vector<1x1xf32> to vector<1x1x1xf32>
      %c0_52 = arith.constant 0 : index
      %c0_53 = arith.constant 0 : index
      %c0_54 = arith.constant 0 : index
      %46 = vector.load %arg7[%c0_52, %c0_53, %c0_54] : memref<1x8x128xf32, #tpu.memory_space<vmem>>, vector<1x8x128xf32>
      %cst_55 = arith.constant dense<0.000000e+00> : vector<1x8xf32>
      %47 = vector.multi_reduction <add>, %46, %cst_55 [2] : vector<1x8x128xf32> to vector<1x8xf32>
      %48 = vector.shape_cast %47 : vector<1x8xf32> to vector<1x8x1xf32>
      %cst_56 = arith.constant dense<0.000000e+00> : vector<1x1xf32>
      %49 = vector.multi_reduction <add>, %48, %cst_56 [1] : vector<1x8x1xf32> to vector<1x1xf32>
      %50 = vector.shape_cast %49 : vector<1x1xf32> to vector<1x1x1xf32>
      %cst_57 = arith.constant 1.024000e+03 : f32
      %51 = vector.broadcast %cst_57 : f32 to vector<1x1x1xf32>
      %52 = arith.mulf %51, %50 : vector<1x1x1xf32>
      %53 = arith.mulf %40, %45 : vector<1x1x1xf32>
      %54 = arith.subf %52, %53 : vector<1x1x1xf32>
      %c0_58 = arith.constant 0 : index
      %c0_59 = arith.constant 0 : index
      %c0_60 = arith.constant 0 : index
      %55 = vector.load %arg8[%c0_58, %c0_59, %c0_60] : memref<1x8x128xf32, #tpu.memory_space<vmem>>, vector<1x8x128xf32>
      %cst_61 = arith.constant dense<0.000000e+00> : vector<1x8xf32>
      %56 = vector.multi_reduction <add>, %55, %cst_61 [2] : vector<1x8x128xf32> to vector<1x8xf32>
      %57 = vector.shape_cast %56 : vector<1x8xf32> to vector<1x8x1xf32>
      %cst_62 = arith.constant dense<0.000000e+00> : vector<1x1xf32>
      %58 = vector.multi_reduction <add>, %57, %cst_62 [1] : vector<1x8x1xf32> to vector<1x1xf32>
      %59 = vector.shape_cast %58 : vector<1x1xf32> to vector<1x1x1xf32>
      %cst_63 = arith.constant 1.024000e+03 : f32
      %60 = vector.broadcast %cst_63 : f32 to vector<1x1x1xf32>
      %61 = arith.mulf %60, %59 : vector<1x1x1xf32>
      %62 = arith.mulf %40, %40 : vector<1x1x1xf32>
      %63 = arith.subf %61, %62 : vector<1x1x1xf32>
      %c0_64 = arith.constant 0 : index
      %c0_65 = arith.constant 0 : index
      %c0_66 = arith.constant 0 : index
      %64 = vector.load %arg9[%c0_64, %c0_65, %c0_66] : memref<1x8x128xf32, #tpu.memory_space<vmem>>, vector<1x8x128xf32>
      %cst_67 = arith.constant dense<0.000000e+00> : vector<1x8xf32>
      %65 = vector.multi_reduction <add>, %64, %cst_67 [2] : vector<1x8x128xf32> to vector<1x8xf32>
      %66 = vector.shape_cast %65 : vector<1x8xf32> to vector<1x8x1xf32>
      %cst_68 = arith.constant dense<0.000000e+00> : vector<1x1xf32>
      %67 = vector.multi_reduction <add>, %66, %cst_68 [1] : vector<1x8x1xf32> to vector<1x1xf32>
      %68 = vector.shape_cast %67 : vector<1x1xf32> to vector<1x1x1xf32>
      %cst_69 = arith.constant 1.024000e+03 : f32
      %69 = vector.broadcast %cst_69 : f32 to vector<1x1x1xf32>
      %70 = arith.mulf %69, %68 : vector<1x1x1xf32>
      %71 = arith.mulf %45, %45 : vector<1x1x1xf32>
      %72 = arith.subf %70, %71 : vector<1x1x1xf32>
      %73 = arith.mulf %63, %72 : vector<1x1x1xf32>
      %74 = math.rsqrt %73 : vector<1x1x1xf32>
      %75 = arith.mulf %54, %74 : vector<1x1x1xf32>
      %cst_70 = arith.constant 1.000000e+00 : f32
      %76 = vector.broadcast %cst_70 : f32 to vector<1x1x1xf32>
      %77 = arith.subf %76, %75 : vector<1x1x1xf32>
      %78 = vector.shape_cast %77 : vector<1x1x1xf32> to vector<1x1x1xf32>
      %79 = vector.broadcast %78 : vector<1x1x1xf32> to vector<1x1x128xf32>
      %c0_71 = arith.constant 0 : index
      %c0_72 = arith.constant 0 : index
      %c0_73 = arith.constant 0 : index
      %80 = vector.load %arg4[%c0_71, %c0_72, %c0_73] : memref<1x1x128xf32, #tpu.memory_space<vmem>>, vector<1x1x128xf32>
      tpu.vector_store %arg4[%c0_71, %c0_72, %c0_73], %79 {strides = array<i32>} : memref<1x1x128xf32, #tpu.memory_space<vmem>>, vector<1x1x128xf32>,
    } else {
    }
    return
  }
  func.func @transform_0(%arg0: i32, %arg1: i32) -> (i32, i32, i32) {
    %c0_i32 = arith.constant 0 : i32
    %c0_i32_0 = arith.constant 0 : i32
    return %arg0, %arg1, %c0_i32 : i32, i32, i32
  }
  func.func @transform_1(%arg0: i32, %arg1: i32) -> (i32, i32, i32) {
    %c0_i32 = arith.constant 0 : i32
    %c0_i32_0 = arith.constant 0 : i32
    return %arg0, %arg1, %c0_i32 : i32, i32, i32
  }
  func.func @transform_2(%arg0: i32, %arg1: i32) -> (i32, i32, i32) {
    %c0_i32 = arith.constant 0 : i32
    %c0_i32_0 = arith.constant 0 : i32
    %c0_i32_1 = arith.constant 0 : i32
    return %arg0, %c0_i32, %c0_i32_0 : i32, i32, i32
  }
}

</mosaic_0001>

<bundles_post_ra>
// kernel: tpu_custom_call.1
= control target key start
LH: loop header
LB: loop body
LE: loop exit
PB: predicated region body
PF: predicated region fallthrough
CT: control target
= control target key end

     0   :  { %7 = vsyncpa [#allocation8], 0  ;;  %s891_s0 = inlined_call_operand.hbm [shape: f32[2,8,128], index: 0, kind: input, shape index: {}]   ;;  %s892_s1 = inlined_call_operand.hbm [shape: f32[2,8,128], index: 1, kind: input, shape index: {}]   ;;  %s893_s2 = inlined_call_operand.hbm [shape: f32[2,1,128], index: 2, kind: output, shape index: {}]  }
   0x1   :  { %9 = vsyncpa [#allocation8 + $0x1], 0 }
   0x2   :  { %10 = vsyncpa [#allocation11], 0 }
   0x3   :  { %12 = vsyncpa [#allocation11 + $0x1], 0 }
   0x4   :  { %13 = vsyncpa [#allocation9], 0 }
   0x5   :  { %15 = vsyncpa [#allocation9 + $0x1], 0  ;;  %s670_s9 = smov 0   ;;  %s672_s10 = smov 0  }
   0x6   :  { %s674_s11 = smov 0   ;;  %s676_s12 = smov 0  }
   0x7   :  { %s678_s13 = smov 0   ;;  %s680_s14 = smov 0  }
   0x8 LB: > { %s421_s15 = sadd.s32 4294967295, %s650_s14   ;;  %s422_s16 = sadd.s32 4294967294, %s650_s14   ;;  %s650_s14 = sphi %s680_s14, %s21_s14   ;;  %s646_s13 = sphi %s678_s13, %s913_s13   ;;  %s642_s12 = sphi %s676_s12, %s912_s12   ;;  %s638_s11 = sphi %s674_s11, %s911_s11   ;;  %s634_s10 = sphi %s672_s10, %s910_s10   ;;  %s630_s9 = sphi %s670_s9, %s909_s9  }
   0x9   : > { %s33_s17 = sadd.s32 1, %s646_s13  ;;  %s42_s18 = sadd.s32 1, %s638_s11 }
   0xa   : > { %p35_p0 = scmp.ge.s32.totalorder %s33_s17, 2  ;;  %p49_p1 = scmp.ne.s32.totalorder %s638_s11, %s634_s10 }
   0xb   : > { %p50_p2 = scmp.eq.s32.totalorder %s650_s14, 0  ;;  %p55_p3 = scmp.ne.s32.totalorder %s634_s10, %s630_s9 }
   0xc   : > { %s915_s17 = smov (%p35_p0, %s33_s17), 0  ;;  %p56_p5 = scmp.eq.s32.totalorder %s421_s15, 0 }
   0xd   : > { %p711_p4 = por %p50_p2, %p49_p1  ;;  %s37_s20 = ssub.s32 %s646_s13, %s915_s17 }
   0xe   : > { %p107_p6 = scmp.eq.s32.totalorder %s421_s15, 1  ;;  %p40_p7 = scmp.eq.s32.totalorder %s37_s20, 0 }
   0xf   : > { %p717_p8 = por %p56_p5, %p55_p3  ;;  %p113_p10 = scmp.eq.s32.totalorder %s422_s16, 1 }
  0x10   : > { %p721_p9 = por %p107_p6, %p49_p1  ;;  %p452_p13 = scmp.lt.s32.totalorder %s650_s14, 2 }
  0x11   : > { %s897_s21 = scalar_select %p717_p8, 1, 0 }
  0x12   : > { %s898_s22 = scalar_select %p721_p9, 1, 0 }
  0x13   : > { %s726_s23 = scalar_select %p40_p7, %s638_s11, %s42_s18  }
  0x14   : > { %p728_p11 = por %p113_p10, %p55_p3  ;;  %s735_s25 = sand.u32 1, %s638_s11  }
  0x15   : > { %s425_s26 = sshll.u32 %s735_s25, 3  ;;  %s426_s27 = sshll.u32 %s646_s13, 7 }
  0x16   : > { %s899_s24 = scalar_select %p728_p11, 1, 0 }
  0x17   : > { %s744_s30 = scalar_lea.hbm %s891_s0, %s426_s27  ;;  %s137_s3 = scalar_lea.vmem [#allocation7], %s425_s26 }
  0x18   : > { %s145_s4 = sshll.u32 %s137_s3, 4  ;;  %p752_p0 = pnand %p452_p13, %p711_p4  ;;  %s748_s4 = int_to_ptr.vmem [resolvable:$true] %s145_s4 }
  0x19   : > { %s134_s6 = scalar_lea.sflag [#allocation8], %s735_s25  ;;  %s504_s7 = scalar_lea.hbm %s744_s30, 128 }
  0x1a   : > { %p505_p3 = scmp.ne.s32.totalorder %s744_s30, %s504_s7  ;;  %p506_p5 = pneg %p752_p0 }
  0x1b   : > { %s509_s16 = scalar_lea.hbm %s891_s0, 256  ;;  %p510_p4 = scmp.lt.u32.totalorder %s744_s30, %s891_s0 }
  0x1c   : > { %p507_p6 = pnand %p506_p5, %p505_p3  ;;  %p511_p10 = scmp.lt.u32.totalorder %s509_s16, %s504_s7 }
  0x1d   : > { %p513_p12 = scmp.lt.u32.totalorder %s504_s7, %s744_s30 }
  0x1e   : > { %p508_p7 = pneg %p507_p6  ;;  %p512_p13 = por %p511_p10, %p510_p4 }
  0x20   : > { %p514_p1 = por %p513_p12, %p512_p13 }
  0x22   : > { %p515_p2 = pnand %p514_p1, %p508_p7 }
  0x24   : > { %518 = shalt.err (!%p515_p2)
}
  0x25   : > { %s519_s20 = scalar_lea.vmem %s748_s4, 128  ;;  %s652_s28 = smov [#allocation7]  }
  0x26   : > { %p520_p3 = scmp.ne.s32.totalorder %s748_s4, %s519_s20  ;;  %s524_s29 = sshll.u32 %s652_s28, 4  ;;  %s525_s29 = int_to_ptr.vmem [resolvable:$false] %s524_s29 }
  0x27   : > { %s526_s3 = scalar_lea.vmem %s525_s29, 256  ;;  %p527_p9 = scmp.lt.s32.totalorder %s748_s4, %s525_s29 }
  0x28   : > { %p522_p6 = pnand %p520_p3, %p506_p5  ;;  %p528_p4 = scmp.lt.s32.totalorder %s526_s3, %s519_s20 }
  0x2a   : > { %p523_p11 = pneg %p522_p6  ;;  %p529_p10 = por %p528_p4, %p527_p9 }
  0x2c   : > { %p530_p12 = pnand %p529_p10, %p523_p11 }
  0x2e   : > { %533 = shalt.err (!%p530_p12)
}
  0x2f   : > { %444 = dma.hbm_to_vmem [thread:$0]  (!%p752_p0), %s744_s30, 128, %s748_s4, %s134_s6  }
  0x30   : > { %p901_p1 = scmp.lt.s32.totalorder %s650_s14, 3  ;;  %p902_p2 = scmp.ge.s32.totalorder %s650_s14, 1 }
  0x31   : > { %s797_s16 = scalar_lea.hbm %s892_s1, %s426_s27  ;;  %s156_s18 = scalar_lea.vmem [#allocation10], %s425_s26 }
  0x32   : > { %p788_p7 = pnand %p902_p2, %p901_p1  ;;  %s164_s19 = sshll.u32 %s156_s18, 4  ;;  %s165_s19 = int_to_ptr.vmem [resolvable:$true] %s164_s19 }
  0x33   : > { %s153_s30 = scalar_lea.sflag [#allocation11], %s735_s25  ;;  %s534_s4 = scalar_lea.hbm %s797_s16, 128 }
  0x34   : > { %s903_s7 = scalar_select %p788_p7, 1, 0 }
  0x35   : > { %p535_p9 = scmp.ne.s32.totalorder %s797_s16, %s534_s4  ;;  %s539_s27 = scalar_lea.hbm %s892_s1, 256 }
  0x36   : > { %p540_p3 = scmp.lt.u32.totalorder %s797_s16, %s892_s1  ;;  %p541_p6 = scmp.lt.u32.totalorder %s539_s27, %s534_s4 }
  0x37   : > { %p537_p11 = pnand %p535_p9, %p506_p5  ;;  %p543_p10 = scmp.lt.u32.totalorder %s534_s4, %s797_s16 }
  0x38   : > { %p542_p4 = por %p541_p6, %p540_p3 }
  0x39   : > { %p538_p13 = pneg %p537_p11 }
  0x3a   : > { %p544_p12 = por %p543_p10, %p542_p4 }
  0x3c   : > { %p545_p1 = pnand %p544_p12, %p538_p13 }
  0x3e   : > { %548 = shalt.err (!%p545_p1)
}
  0x3f   : > { %s549_s25 = scalar_lea.vmem %s165_s19, 128  ;;  %s653_s26 = smov [#allocation10]  }
  0x40   : > { %p550_p2 = scmp.ne.s32.totalorder %s165_s19, %s549_s25  ;;  %s554_s3 = sshll.u32 %s653_s26, 4  ;;  %s555_s3 = int_to_ptr.vmem [resolvable:$false] %s554_s3 }
  0x41   : > { %s556_s8 = scalar_lea.vmem %s555_s3, 256  ;;  %p557_p8 = scmp.lt.s32.totalorder %s165_s19, %s555_s3 }
  0x42   : > { %p552_p9 = pnand %p550_p2, %p506_p5  ;;  %p558_p7 = scmp.lt.s32.totalorder %s556_s8, %s549_s25 }
  0x44   : > { %p553_p11 = pneg %p552_p9  ;;  %p559_p3 = por %p558_p7, %p557_p8 }
  0x46   : > { %p560_p6 = pnand %p559_p3, %p553_p11 }
  0x48   : > { %563 = shalt.err (!%p560_p6)
}
  0x49   : > { %447 = dma.hbm_to_vmem [thread:$0]  (!%p752_p0), %s797_s16, 128, %s165_s19, %s153_s30  }
  0x4a   : > { %p904_p13 = scmp.ne.s32.totalorder %s903_s7, 0 }
  0x4b   : > { %s824_s15 = sand.u32 (!%p904_p13), 1, %s634_s10   ;;  %p905_p5 = scmp.ne.s32.totalorder (!%p904_p13), %s897_s21, 0 }
  0x4c   : > { %173 = sbr.rel (%p904_p13) target bundleno = 282 (0x11a), region = 28  ;;  %s430_s18 = sshll.u32 (!%p904_p13), %s824_s15, 3 }
  0x4d   : > { %s176_s4 = scalar_lea.sflag (!%p904_p13), [#allocation8], %s824_s15  ;;  %s179_s6 = scalar_lea.vmem (!%p904_p13), [#allocation7], %s430_s18 }
  0x53   : > { %617 = dma.done.wait (%p905_p5), %s176_s4, 128  }
  0x54   : > { %619 = vsyncadd (%p905_p5), %s176_s4, 4294967168  ;;  %s185_s5 = scalar_lea.sflag [#allocation11], %s824_s15  ;;  %s188_s16 = scalar_lea.vmem [#allocation10], %s430_s18 }
  0x55   : > { %621 = dma.done.wait (%p905_p5), %s185_s5, 128  }
  0x56   : > { %623 = vsyncadd (%p905_p5), %s185_s5, 4294967168  ;;  %v222_v0 = vld [vmem:[%s179_s6] sm:$0xff]  ;;  %v223_v1 = vld [vmem:[%s188_s16] sm:$0xff]  ;;  %s432_s21 = sshll.u32 %s642_s12, 4  ;;  %s212_s7 = scalar_lea.vmem [#allocation12], %s824_s15 }
  0x57   : > { %251 = vadd.xlane.f32.xlu0 %v222_v0  ;;  %v238_v2 = vmul.f32 %v222_v0, %v222_v0  ;;  %v243_v3 = vmul.f32 %v223_v1, %v223_v1  ;;  %v233_v4 = vmul.f32 %v223_v1, %v222_v0  ;;  %s322_s19 = sshll.u32 %s212_s7, 4  ;;  %s842_s27 = scalar_lea.hbm %s893_s2, %s432_s21  ;;  %s844_s19 = int_to_ptr.vmem [resolvable:$true] %s322_s19 }
  0x58   : > { %s310_s28 = scalar_lea.sflag [#allocation9], %s824_s15  ;;  %s564_s29 = scalar_lea.vmem %s844_s19, 16 }
  0x59   : > { %281 = vadd.xlane.f32.xlu1 %v238_v2  ;;  %p565_p8 = scmp.ne.s32.totalorder %s844_s19, %s564_s29  ;;  %p906_p0 = scmp.ne.s32.totalorder %s898_s22, 0 }
  0x5a   : > { %s654_s12 = smov [#allocation12]  }
  0x5b   : > { %260 = vadd.xlane.f32.xlu0 %v223_v1  ;;  %p566_p7 = pnand %p565_p8, %p906_p0  ;;  %s568_s25 = sshll.u32 %s654_s12, 4  ;;  %s569_s25 = int_to_ptr.vmem [resolvable:$false] %s568_s25 }
  0x5c   : > { %s570_s26 = scalar_lea.vmem %s569_s25, 32  ;;  %p571_p10 = scmp.lt.s32.totalorder %s844_s19, %s569_s25 }
  0x5d   : > { %293 = vadd.xlane.f32.xlu1 %v243_v3  ;;  %p567_p4 = pneg %p566_p7  ;;  %p572_p12 = scmp.lt.s32.totalorder %s570_s26, %s564_s29 }
  0x5f   : > { %269 = vadd.xlane.f32.xlu0 %v233_v4  ;;  %p573_p1 = por %p572_p12, %p571_p10 }
  0x61   : > { %p574_p2 = pnand %p573_p1, %p567_p4 }
  0xe4   : > { %v252_v5 = vpop.xlane.xlu0 %251 }
  0xe5   : > { %v253_v6 = vrot.slane %v252_v5, 4 }
  0xe6   : > { %v282_v7 = vpop.xlane.xlu1 %281 }
  0xe7   : > { %v254_v8 = vadd.f32 %v253_v6, %v252_v5  ;;  %v283_v9 = vrot.slane %v282_v7, 4 }
  0xe8   : > { %v261_v10 = vpop.xlane.xlu0 %260 }
  0xe9   : > { %v255_v11 = vrot.slane %v254_v8, 2  ;;  %v284_v12 = vadd.f32 %v283_v9, %v282_v7  ;;  %v262_v13 = vrot.slane %v261_v10, 4 }
  0xea   : > { %v294_v14 = vpop.xlane.xlu1 %293 }
  0xeb   : > { %v256_v15 = vadd.f32 %v255_v11, %v254_v8  ;;  %v285_v16 = vrot.slane %v284_v12, 2  ;;  %v263_v17 = vadd.f32 %v262_v13, %v261_v10  ;;  %v295_v18 = vrot.slane %v294_v14, 4 }
  0xec   : > { %v270_v19 = vpop.xlane.xlu0 %269 }
  0xed   : > { %v286_v20 = vadd.f32 %v285_v16, %v284_v12  ;;  %v264_v21 = vrot.slane %v263_v17, 2  ;;  %v296_v22 = vadd.f32 %v295_v18, %v294_v14  ;;  %v271_v23 = vrot.slane %v270_v19, 4 }
  0xee   : > { %v257_v24 = vrot.slane %v256_v15, 1 }
  0xef   : > { %v287_v25 = vrot.slane %v286_v20, 1  ;;  %v265_v26 = vadd.f32 %v264_v21, %v263_v17  ;;  %v297_v27 = vrot.slane %v296_v22, 2  ;;  %v272_v28 = vadd.f32 %v271_v23, %v270_v19 }
  0xf0   : > { %v258_v33 = vadd.f32 %v257_v24, %v256_v15 }
  0xf1   : > { %v288_v29 = vadd.f32 %v287_v25, %v286_v20  ;;  %v266_v30 = vrot.slane %v265_v26, 1  ;;  %v298_v31 = vadd.f32 %v297_v27, %v296_v22  ;;  %v273_v32 = vrot.slane %v272_v28, 2 }
  0xf2   : > { %v290_v39 = vmul.f32 %v258_v33, %v258_v33 }
  0xf3   : > { %v267_v34 = vadd.f32 %v266_v30, %v265_v26  ;;  %v299_v35 = vrot.slane %v298_v31, 1  ;;  %v289_v36 = vmul.f32 1024.0, %v288_v29  ;;  %v274_v38 = vadd.f32 %v273_v32, %v272_v28 }
  0xf5   : > { %v300_v37 = vadd.f32 %v299_v35, %v298_v31  ;;  %v302_v40 = vmul.f32 %v267_v34, %v267_v34  ;;  %v291_v42 = vsub.f32 %v289_v36, %v290_v39  ;;  %v275_v44 = vrot.slane %v274_v38, 1 }
  0xf6   : > { %v278_v48 = vmul.f32 %v267_v34, %v258_v33 }
  0xf7   : > { %v301_v41 = vmul.f32 1024.0, %v300_v37  ;;  %v276_v46 = vadd.f32 %v275_v44, %v274_v38 }
  0xf9   : > { %v303_v43 = vsub.f32 %v301_v41, %v302_v40  ;;  %v277_v47 = vmul.f32 1024.0, %v276_v46 }
  0xfb   : > { %v304_v45 = vmul.f32 %v303_v43, %v291_v42  ;;  %v279_v49 = vsub.f32 %v277_v47, %v278_v48 }
  0xfd   : > { %502 = vrsqrt.f32 %v304_v45 }
 0x107   : > { %v503_v50 = vpop.eup %502 }
 0x108   : > { %v306_v51 = vmul.f32 %v503_v50, %v279_v49 }
 0x10a   : > { %v307_v52 = vsub.f32 1.0, %v306_v51 }
 0x10c   : > { %308 = vst [vmem:[%s212_s7] sm:$0x1] %v307_v52 }
 0x10d   : > { %577 = shalt.err (!%p574_p2)
}
 0x10e   : > { %s578_s3 = scalar_lea.hbm %s842_s27, 16  ;;  %s582_s18 = scalar_lea.hbm %s893_s2, 32 }
 0x10f   : > { %p579_p9 = scmp.ne.s32.totalorder %s842_s27, %s578_s3  ;;  %p583_p6 = scmp.lt.u32.totalorder %s842_s27, %s893_s2 }
 0x110   : > { %p584_p13 = scmp.lt.u32.totalorder %s582_s18, %s578_s3  ;;  %p586_p8 = scmp.lt.u32.totalorder %s578_s3, %s842_s27 }
 0x111   : > { %p580_p11 = pnand %p579_p9, %p906_p0 }
 0x112   : > { %p585_p5 = por %p584_p13, %p583_p6 }
 0x113   : > { %p581_p3 = pneg %p580_p11 }
 0x114   : > { %p587_p7 = por %p586_p8, %p585_p5 }
 0x116   : > { %p588_p4 = pnand %p587_p7, %p581_p3 }
 0x118   : > { %591 = shalt.err (!%p588_p4)
}
 0x119   : > { %439 = dma.vmem_to_hbm [thread:$0]  (%p906_p0), %s844_s19, 16, %s842_s27, %s310_s28  }
 0x11a PF: > { %s334_s5 = sand.u32 1, %s630_s9   ;;  %p907_p10 = scmp.ne.s32.totalorder %s899_s24, 0 }
 0x11b   : > { %p908_p12 = scmp.ge.s32.totalorder %s650_s14, 2  ;;  %s335_s16 = scalar_lea.sflag [#allocation9], %s334_s5 }
 0x11d   : > { %p449_p1 = pnand %p908_p12, %p907_p10 }
 0x11f   : > { %625 = dma.done.wait (!%p449_p1), %s335_s16, 16  }
 0x120   : > { %627 = vsyncadd (!%p449_p1), %s335_s16, 4294967280  ;;  %s21_s14 = sadd.s32 1, %s650_s14   ;;  %s909_s9 = smov %s634_s10 }
 0x121   : > { %p18_p2 = scmp.ge.s32.totalorder %s21_s14, 4   ;;  %s910_s10 = smov %s638_s11 }
 0x122   : > { %s911_s11 = smov %s726_s23  ;;  %s912_s12 = smov %s646_s13 }
 0x123   : > { %s913_s13 = smov %s915_s17  ;;  %20 = sbr.rel (!%p18_p2) target bundleno = 8 (0x8), region = 94 }
 0x12a   :  { %339 = vsyncpa [#allocation8], 1 }
 0x12b   :  { %341 = vsyncpa [#allocation8 + $0x1], 1 }
 0x12c   :  { %342 = vsyncpa [#allocation11], 1 }
 0x12d   :  { %344 = vsyncpa [#allocation11 + $0x1], 1 }
 0x12e   :  { %345 = vsyncpa [#allocation9], 1 }
 0x12f   :  { %347 = vsyncpa [#allocation9 + $0x1], 1 }

</bundles_post_ra>
